<compile_context>
chip_gen: v6e
topology: v6e:2x2x1
jax: 0.10.0
libtpu: 0.0.40
codegen_flags: <defaults>
</compile_context>

<pallas_src>
import math

import jax
import jax.numpy as jnp
from jax.experimental import pallas as pl
from jax.experimental.pallas import tpu as pltpu


def discnet_kernel(x_ref, w1_ref, b1_ref, w2_ref, b2_ref, w3_ref, b3_ref, o_ref):
    # Layer 1: Linear + ReLU (+ dropout == identity in eval mode)
    h = jnp.dot(x_ref[...], w1_ref[...], preferred_element_type=jnp.float32)
    h = jnp.maximum(h + b1_ref[...], 0.0)

    # Layer 2: Linear + ReLU (+ dropout == identity in eval mode)
    h = jnp.dot(h, w2_ref[...], preferred_element_type=jnp.float32)
    h = jnp.maximum(h + b2_ref[...], 0.0)

    # Output layer: Linear (no activation); out-dim is lane-dense (padded 128)
    out = jnp.dot(h, w3_ref[...], preferred_element_type=jnp.float32)
    o_ref[...] = (out + b3_ref[...]).astype(o_ref.dtype)


def _round_up(n, m):
    return ((n + m - 1) // m) * m


def discnet_forward(x, params, *, tile_b=128):
    """x: (B, input_dim) f32. params: dict of w1,b1,w2,b2,w3,b3 (w as (in,out))."""
    B, in_dim = x.shape
    h1 = params["w1"].shape[1]
    h2 = params["w2"].shape[1]
    out_dim = params["w3"].shape[1]

    # --- lane-dense output: pad final layer's out-dim up to a multiple of 128
    out_pad = _round_up(max(out_dim, 128), 128)
    w3p = jnp.zeros((h2, out_pad), jnp.float32).at[:, :out_dim].set(params["w3"])
    b3p = jnp.zeros((1, out_pad), jnp.float32).at[:, :out_dim].set(params["b3"])

    # --- pad batch up to a multiple of the batch tile so we can grid over it
    b_pad = _round_up(B, tile_b)
    xp = x if b_pad == B else jnp.zeros((b_pad, in_dim), x.dtype).at[:B].set(x)

    grid = (b_pad // tile_b,)

    # Weights/biases: constant index_map -> resident in VMEM across grid steps.
    def resident(shape):
        return pl.BlockSpec(shape, lambda i: (0, 0))

    flops = 2 * b_pad * (in_dim * h1 + h1 * h2 + h2 * out_pad)
    bytes_accessed = 4 * (
        xp.size
        + params["w1"].size + params["b1"].size
        + params["w2"].size + params["b2"].size
        + w3p.size + b3p.size
        + b_pad * out_pad
    )

    out = pl.pallas_call(
        discnet_kernel,
        out_shape=jax.ShapeDtypeStruct((b_pad, out_pad), jnp.float32),
        grid=grid,
        in_specs=[
            pl.BlockSpec((tile_b, in_dim), lambda i: (i, 0)),   # streamed x tile
            resident(params["w1"].shape),
            resident(params["b1"].shape),
            resident(params["w2"].shape),
            resident(params["b2"].shape),
            resident(w3p.shape),
            resident(b3p.shape),
        ],
        out_specs=pl.BlockSpec((tile_b, out_pad), lambda i: (i, 0)),
        compiler_params=pltpu.CompilerParams(
            dimension_semantics=("parallel",),
        ),
        cost_estimate=pl.CostEstimate(
            flops=flops, transcendentals=0, bytes_accessed=bytes_accessed
        ),
    )(xp, params["w1"], params["b1"], params["w2"], params["b2"], w3p, b3p)

    return out[:B, :out_dim]


def init_linear(key, fan_in, fan_out):
    """Deterministic init matching PyTorch nn.Linear's uniform bounds."""
    kw, kb = jax.random.split(key)
    bound = 1.0 / math.sqrt(fan_in)
    # stored as (in, out) so the kernel computes x @ W
    w = jax.random.uniform(kw, (fan_in, fan_out), jnp.float32, -bound, bound)
    b = jax.random.uniform(kb, (1, fan_out), jnp.float32, -bound, bound)
    return w, b


def reference_forward(x, params):
    h = jnp.maximum(x @ params["w1"] + params["b1"], 0.0)
    h = jnp.maximum(h @ params["w2"] + params["b2"], 0.0)
    return h @ params["w3"] + params["b3"]


if __name__ == "__main__":
    # DiscNet(input_dim=32, hidden_dims=[64, 32], output_dim=2)
    batch = 8
    input_dim = 32
    hidden_dims = [64, 32]
    output_dim = 2

    key = jax.random.PRNGKey(0)
    kx, k1, k2, k3 = jax.random.split(key, 4)

    x = jax.random.normal(kx, (batch, input_dim), jnp.float32)

    w1, b1 = init_linear(k1, input_dim, hidden_dims[0])
    w2, b2 = init_linear(k2, hidden_dims[0], hidden_dims[1])
    w3, b3 = init_linear(k3, hidden_dims[1], output_dim)
    params = {"w1": w1, "b1": b1, "w2": w2, "b2": b2, "w3": w3, "b3": b3}

    out = discnet_forward(x, params)
    out = jax.block_until_ready(out)

    ref = reference_forward(x, params)
    assert out.shape == (batch, output_dim)
    assert jnp.allclose(out, ref, atol=1e-5, rtol=1e-5), "mismatch vs reference"

    print("KERNEL_OK")
</pallas_src>

<mosaic_0001>
module attributes {stable_mosaic.version = 11 : i64} {
  func.func @discnet_kernel(%arg0: i32, %arg1: memref<128x32xf32, #tpu.memory_space<vmem>>, %arg2: memref<32x64xf32, #tpu.memory_space<vmem>>, %arg3: memref<1x64xf32, #tpu.memory_space<vmem>>, %arg4: memref<64x32xf32, #tpu.memory_space<vmem>>, %arg5: memref<1x32xf32, #tpu.memory_space<vmem>>, %arg6: memref<32x128xf32, #tpu.memory_space<vmem>>, %arg7: memref<1x128xf32, #tpu.memory_space<vmem>>, %arg8: memref<128x128xf32, #tpu.memory_space<vmem>>) attributes {dimension_semantics = [#tpu.dimension_semantics<parallel>], iteration_bounds = array<i64: 1>, scalar_prefetch = 0 : i64, scratch_operands = 0 : i64, tpu.core_type = #tpu.core_type<tc>, window_params = [{transform_indices = @transform_0, window_bounds = array<i64: 128, 32>}, {pipeline_mode = #tpu.pipeline_mode<synchronous>, transform_indices = @transform_1, window_bounds = array<i64: 32, 64>}, {pipeline_mode = #tpu.pipeline_mode<synchronous>, transform_indices = @transform_2, window_bounds = array<i64: 1, 64>}, {pipeline_mode = #tpu.pipeline_mode<synchronous>, transform_indices = @transform_3, window_bounds = array<i64: 64, 32>}, {pipeline_mode = #tpu.pipeline_mode<synchronous>, transform_indices = @transform_4, window_bounds = array<i64: 1, 32>}, {pipeline_mode = #tpu.pipeline_mode<synchronous>, transform_indices = @transform_5, window_bounds = array<i64: 32, 128>}, {pipeline_mode = #tpu.pipeline_mode<synchronous>, transform_indices = @transform_6, window_bounds = array<i64: 1, 128>}, {transform_indices = @transform_7, window_bounds = array<i64: 128, 128>}]} {
    %c0 = arith.constant 0 : index
    %c0_0 = arith.constant 0 : index
    %0 = vector.load %arg1[%c0, %c0_0] : memref<128x32xf32, #tpu.memory_space<vmem>>, vector<128x32xf32>
    %c0_1 = arith.constant 0 : index
    %c0_2 = arith.constant 0 : index
    %1 = vector.load %arg2[%c0_1, %c0_2] : memref<32x64xf32, #tpu.memory_space<vmem>>, vector<32x64xf32>
    %cst = arith.constant dense<0.000000e+00> : vector<128x64xf32>
    %2 = tpu.matmul %0, %1, %cst {dimension_numbers = #tpu.dot_dimension_numbers<[1], [0], [0], [1], [0, 0, 1, 1], [], []>} : vector<128x32xf32>, vector<32x64xf32>, vector<128x64xf32> -> vector<128x64xf32>
    %c0_3 = arith.constant 0 : index
    %c0_4 = arith.constant 0 : index
    %3 = vector.load %arg3[%c0_3, %c0_4] : memref<1x64xf32, #tpu.memory_space<vmem>>, vector<1x64xf32>
    %4 = vector.broadcast %3 : vector<1x64xf32> to vector<128x64xf32>
    %5 = arith.addf %2, %4 : vector<128x64xf32>
    %cst_5 = arith.constant 0.000000e+00 : f32
    %6 = vector.broadcast %cst_5 : f32 to vector<128x64xf32>
    %7 = arith.maximumf %5, %6 : vector<128x64xf32>
    %c0_6 = arith.constant 0 : index
    %c0_7 = arith.constant 0 : index
    %8 = vector.load %arg4[%c0_6, %c0_7] : memref<64x32xf32, #tpu.memory_space<vmem>>, vector<64x32xf32>
    %cst_8 = arith.constant dense<0.000000e+00> : vector<128x32xf32>
    %9 = tpu.matmul %7, %8, %cst_8 {dimension_numbers = #tpu.dot_dimension_numbers<[1], [0], [0], [1], [0, 0, 1, 1], [], []>} : vector<128x64xf32>, vector<64x32xf32>, vector<128x32xf32> -> vector<128x32xf32>
    %c0_9 = arith.constant 0 : index
    %c0_10 = arith.constant 0 : index
    %10 = vector.load %arg5[%c0_9, %c0_10] : memref<1x32xf32, #tpu.memory_space<vmem>>, vector<1x32xf32>
    %11 = vector.broadcast %10 : vector<1x32xf32> to vector<128x32xf32>
    %12 = arith.addf %9, %11 : vector<128x32xf32>
    %cst_11 = arith.constant 0.000000e+00 : f32
    %13 = vector.broadcast %cst_11 : f32 to vector<128x32xf32>
    %14 = arith.maximumf %12, %13 : vector<128x32xf32>
    %c0_12 = arith.constant 0 : index
    %c0_13 = arith.constant 0 : index
    %15 = vector.load %arg6[%c0_12, %c0_13] : memref<32x128xf32, #tpu.memory_space<vmem>>, vector<32x128xf32>
    %cst_14 = arith.constant dense<0.000000e+00> : vector<128x128xf32>
    %16 = tpu.matmul %14, %15, %cst_14 {dimension_numbers = #tpu.dot_dimension_numbers<[1], [0], [0], [1], [0, 0, 1, 1], [], []>} : vector<128x32xf32>, vector<32x128xf32>, vector<128x128xf32> -> vector<128x128xf32>
    %c0_15 = arith.constant 0 : index
    %c0_16 = arith.constant 0 : index
    %17 = vector.load %arg7[%c0_15, %c0_16] : memref<1x128xf32, #tpu.memory_space<vmem>>, vector<1x128xf32>
    %18 = vector.broadcast %17 : vector<1x128xf32> to vector<128x128xf32>
    %19 = arith.addf %16, %18 : vector<128x128xf32>
    %c0_17 = arith.constant 0 : index
    %c0_18 = arith.constant 0 : index
    %20 = vector.load %arg8[%c0_17, %c0_18] : memref<128x128xf32, #tpu.memory_space<vmem>>, vector<128x128xf32>
    tpu.vector_store %arg8[%c0_17, %c0_18], %19 {strides = array<i32>} : memref<128x128xf32, #tpu.memory_space<vmem>>, vector<128x128xf32>,
    return
  }
  func.func @transform_0(%arg0: i32) -> (i32, i32) {
    %c0_i32 = arith.constant 0 : i32
    %c0_i32_0 = arith.constant 0 : i32
    return %arg0, %c0_i32 : i32, i32
  }
  func.func @transform_1(%arg0: i32) -> (i32, i32) {
    %c0_i32 = arith.constant 0 : i32
    %c0_i32_0 = arith.constant 0 : i32
    %c0_i32_1 = arith.constant 0 : i32
    return %c0_i32, %c0_i32_0 : i32, i32
  }
  func.func @transform_2(%arg0: i32) -> (i32, i32) {
    %c0_i32 = arith.constant 0 : i32
    %c0_i32_0 = arith.constant 0 : i32
    %c0_i32_1 = arith.constant 0 : i32
    return %c0_i32, %c0_i32_0 : i32, i32
  }
  func.func @transform_3(%arg0: i32) -> (i32, i32) {
    %c0_i32 = arith.constant 0 : i32
    %c0_i32_0 = arith.constant 0 : i32
    %c0_i32_1 = arith.constant 0 : i32
    return %c0_i32, %c0_i32_0 : i32, i32
  }
  func.func @transform_4(%arg0: i32) -> (i32, i32) {
    %c0_i32 = arith.constant 0 : i32
    %c0_i32_0 = arith.constant 0 : i32
    %c0_i32_1 = arith.constant 0 : i32
    return %c0_i32, %c0_i32_0 : i32, i32
  }
  func.func @transform_5(%arg0: i32) -> (i32, i32) {
    %c0_i32 = arith.constant 0 : i32
    %c0_i32_0 = arith.constant 0 : i32
    %c0_i32_1 = arith.constant 0 : i32
    return %c0_i32, %c0_i32_0 : i32, i32
  }
  func.func @transform_6(%arg0: i32) -> (i32, i32) {
    %c0_i32 = arith.constant 0 : i32
    %c0_i32_0 = arith.constant 0 : i32
    %c0_i32_1 = arith.constant 0 : i32
    return %c0_i32, %c0_i32_0 : i32, i32
  }
  func.func @transform_7(%arg0: i32) -> (i32, i32) {
    %c0_i32 = arith.constant 0 : i32
    %c0_i32_0 = arith.constant 0 : i32
    return %arg0, %c0_i32 : i32, i32
  }
}

</mosaic_0001>

<bundles_post_ra>
// kernel: tpu_custom_call.1
= control target key start
LH: loop header
LB: loop body
LE: loop exit
PB: predicated region body
PF: predicated region fallthrough
CT: control target
= control target key end

     0   :  { %vm54_vm0 = vcmask 261120   ;;  %s1176_s0 = inlined_call_operand.vmem [shape: f32[128,32], index: 0, kind: input, shape index: {}]   ;;  %s1177_s1 = inlined_call_operand.vmem [shape: f32[32,64], index: 1, kind: input, shape index: {}]   ;;  %s1178_s2 = inlined_call_operand.vmem [shape: f32[1,64], index: 2, kind: input, shape index: {}]   ;;  %s1179_s3 = inlined_call_operand.vmem [shape: f32[64,32], index: 3, kind: input, shape index: {}]   ;;  %s1180_s4 = inlined_call_operand.vmem [shape: f32[1,32], index: 4, kind: input, shape index: {}]   ;;  %s1181_s5 = inlined_call_operand.vmem [shape: f32[32,128], index: 5, kind: input, shape index: {}]   ;;  %s1182_s6 = inlined_call_operand.vmem [shape: f32[1,128], index: 6, kind: input, shape index: {}]   ;;  %s1183_s7 = inlined_call_operand.hbm [shape: f32[128,128], index: 7, kind: output, shape index: {}]  }
   0x1   :  { %v46_v0 = vld [vmem:[%s1177_s1 + $0x18] sm:$0xff]  ;;  %v45_v1 = vld [vmem:[%s1177_s1 + $0x10] sm:$0xff]  ;;  %v27_v2 = vld [vmem:[%s1176_s0] sm:$0xff] }
   0x2   :  { %840 = vmatprep.subr.mxu0 %v46_v0  ;;  %944 = vmatprep.subr.mxu1 %v46_v0  ;;  %v44_v3 = vld [vmem:[%s1177_s1 + $0x8] sm:$0xff]  ;;  %v43_v4 = vld [vmem:[%s1177_s1] sm:$0xff]  ;;  %v29_v6 = vld [vmem:[%s1176_s0 + $0x10] sm:$0xff] }
   0x3   :  { %841 = vmatpush3.msra.mxu0 %v46_v0  ;;  %848 = vmatprep.mubr.msk.f32.mxu0 %vm54_vm0, %v27_v2  ;;  %v28_v5 = vld [vmem:[%s1176_s0 + $0x8] sm:$0xff]  ;;  %v35_v7 = vld [vmem:[%s1176_s0 + $0x40] sm:$0xff]  ;;  %v271_v9 = vld [vmem:[%s1179_s3 + $0x38] sm:$0xff] }
   0x4   :  { %842 = vmatprep.subr.mxu0 %v45_v1  ;;  %948 = vmatpush3.msra.mxu1 %v46_v0  ;;  %v36_v8 = vld [vmem:[%s1176_s0 + $0x48] sm:$0xff] }
   0x5   :  { %843 = vmatpush3.msra.mxu0 %v45_v1  ;;  %945 = vmatprep.subr.mxu1 %v45_v1 }
   0x6   :  { %844 = vmatprep.subr.mxu0 %v44_v3  ;;  %949 = vmatpush3.msra.mxu1 %v45_v1 }
   0x7   :  { %845 = vmatpush3.msra.mxu0 %v44_v3  ;;  %946 = vmatprep.subr.mxu1 %v44_v3 }
   0x8   :  { %846 = vmatprep.subr.mxu0 %v43_v4  ;;  %950 = vmatpush3.msra.mxu1 %v44_v3 }
   0x9   :  { %847 = vmatpush3.msra.mxu0 %v43_v4  ;;  %947 = vmatprep.subr.mxu1 %v43_v4 }
   0xa   :  { %12 = vsyncpa [#allocation3], 0  ;;  %849 = vmatmul.mubr.msk.f32.vlgmr.msra.gmra.mxu0 %vm54_vm0, %v28_v5  ;;  %951 = vmatpush3.msra.mxu1 %v43_v4  ;;  %v37_v10 = vld [vmem:[%s1176_s0 + $0x50] sm:$0xff]  ;;  %v30_v11 = vld [vmem:[%s1176_s0 + $0x18] sm:$0xff]  ;;  %vm279_vm1 = vcmask 523264  }
   0xb   :  { %851 = vmatprep.mubr.msk.f32.mxu0 %vm54_vm0, %v29_v6  ;;  %860 = vmatprep.mubr.msk.f32.mxu1 %vm54_vm0, %v35_v7  ;;  %v270_v12 = vld [vmem:[%s1179_s3 + $0x30] sm:$0xff]  ;;  %v31_v13 = vld [vmem:[%s1176_s0 + $0x20] sm:$0xff]  ;;  %v38_v14 = vld [vmem:[%s1176_s0 + $0x58] sm:$0xff] }
   0xc   :  { %861 = vmatmul.mubr.msk.f32.vlgmr.msra.gmra.mxu1 %vm54_vm0, %v36_v8  ;;  %872 = vmatprep.subr.mxu1 %v271_v9  ;;  %v269_v15 = vld [vmem:[%s1179_s3 + $0x28] sm:$0xff]  ;;  %v39_v16 = vld [vmem:[%s1176_s0 + $0x60] sm:$0xff]  ;;  %v33_v19 = vld [vmem:[%s1176_s0 + $0x30] sm:$0xff] }
   0xd   :  { %863 = vmatprep.mubr.msk.f32.mxu1 %vm54_vm0, %v37_v10  ;;  %873 = vmatpush3.msra.mxu1 %v271_v9  ;;  %v32_v17 = vld [vmem:[%s1176_s0 + $0x28] sm:$0xff]  ;;  %v268_v18 = vld [vmem:[%s1179_s3 + $0x20] sm:$0xff]  ;;  %v267_v21 = vld [vmem:[%s1179_s3 + $0x18] sm:$0xff] }
   0xe   :  { %852 = vmatmul.mubr.msk.f32.gmra.mxu0 %vm54_vm0, %v30_v11  ;;  %874 = vmatprep.subr.mxu1 %v270_v12  ;;  %v40_v20 = vld [vmem:[%s1176_s0 + $0x68] sm:$0xff]  ;;  %v41_v22 = vld [vmem:[%s1176_s0 + $0x70] sm:$0xff]  ;;  %v34_v23 = vld [vmem:[%s1176_s0 + $0x38] sm:$0xff] }
   0xf   :  { %854 = vmatprep.mubr.msk.f32.mxu0 %vm54_vm0, %v31_v13  ;;  %875 = vmatpush3.msra.mxu1 %v270_v12  ;;  %v42_v24 = vld [vmem:[%s1176_s0 + $0x78] sm:$0xff]  ;;  %v266_v25 = vld [vmem:[%s1179_s3 + $0x10] sm:$0xff]  ;;  %v265_v26 = vld [vmem:[%s1179_s3 + $0x8] sm:$0xff] }
  0x10   :  { %864 = vmatmul.mubr.msk.f32.gmra.mxu1 %vm54_vm0, %v38_v14  ;;  %876 = vmatprep.subr.mxu1 %v269_v15  ;;  %v264_v27 = vld [vmem:[%s1179_s3] sm:$0xff]  ;;  %v492_v28 = vld [vmem:[%s1181_s5 + $0x18] sm:$0xff]  ;;  %v491_v29 = vld [vmem:[%s1181_s5 + $0x10] sm:$0xff] }
  0x11   :  { %866 = vmatprep.mubr.msk.f32.mxu1 %vm54_vm0, %v39_v16  ;;  %877 = vmatpush3.msra.mxu1 %v269_v15  ;;  %v490_v30 = vld [vmem:[%s1181_s5 + $0x8] sm:$0xff]  ;;  %v725_v31 = vld [vmem:[%s1178_s2] ss:$0 sm:$0xff] }
  0x12   :  { %855 = vmatmul.mubr.msk.f32.gmra.mxu0 %vm54_vm0, %v32_v17  ;;  %878 = vmatprep.subr.mxu1 %v268_v18  ;;  %v489_v16 = vld [vmem:[%s1181_s5] sm:$0xff] }
  0x13   :  { %857 = vmatprep.mubr.msk.f32.mxu0 %vm54_vm0, %v33_v19  ;;  %879 = vmatpush3.msra.mxu1 %v268_v18  ;;  %v742_v17 = vld [vmem:[%s1180_s4] ss:$0 sm:$0xff] }
  0x14   :  { %867 = vmatmul.mubr.msk.f32.gmra.mxu1 %vm54_vm0, %v40_v20  ;;  %880 = vmatprep.subr.mxu1 %v267_v21 }
  0x15   :  { %869 = vmatprep.mubr.msk.f32.mxu1 %vm54_vm0, %v41_v22  ;;  %881 = vmatpush3.msra.mxu1 %v267_v21 }
  0x16   :  { %858 = vmatmul.mubr.msk.f32.gmra.mxu0 %vm54_vm0, %v34_v23  ;;  %882 = vmatprep.subr.mxu1 %v266_v25 }
  0x17   :  { %883 = vmatpush3.msra.mxu1 %v266_v25  ;;  %912 = vmatprep.subr.mxu0 %v492_v28 }
  0x18   :  { %870 = vmatmul.mubr.msk.f32.gmra.mxu1 %vm54_vm0, %v42_v24  ;;  %884 = vmatprep.subr.mxu1 %v265_v26 }
  0x19   :  { %885 = vmatpush3.msra.mxu1 %v265_v26  ;;  %913 = vmatpush3.msra.mxu0 %v492_v28 }
  0x1a   :  { %886 = vmatprep.subr.mxu1 %v264_v27  ;;  %914 = vmatprep.subr.mxu0 %v491_v29 }
  0x1b   :  { %887 = vmatpush3.msra.mxu1 %v264_v27  ;;  %915 = vmatpush3.msra.mxu0 %v491_v29 }
  0x1c   :  { %916 = vmatprep.subr.mxu0 %v490_v30 }
  0x1d   :  { %917 = vmatpush3.msra.mxu0 %v490_v30 }
  0x1e   :  { %918 = vmatprep.subr.mxu0 %v489_v16 }
  0x1f   :  { %919 = vmatpush3.msra.mxu0 %v489_v16 }
  0xca   :  { %v850_v32 = vpop.f32.mrf.mxu0 }
  0xcb   :  { %v175_v33 = vadd.f32 %v850_v32, %v725_v31 }
  0xcc   :  { %v169_v34 = vpop.f32.mrf.mxu0  ;;  %v862_v35 = vpop.f32.mrf.mxu1 }
  0xcd   :  { %v170_v36 = vadd.f32 %v725_v31, %v169_v34  ;;  %v249_v40 = vmax.f32 %v175_v33, 0.0  ;;  %v215_v1 = vadd.f32 %v862_v35, %v725_v31 }
  0xce   :  { %v853_v37 = vpop.f32.mrf.mxu0  ;;  %v209_v38 = vpop.f32.mrf.mxu1 }
  0xcf   :  { %v248_v39 = vmax.f32 %v170_v36, 0.0  ;;  %v185_v41 = vadd.f32 %v853_v37, %v725_v31  ;;  %v210_v55 = vadd.f32 %v725_v31, %v209_v38  ;;  %v257_v5 = vmax.f32 %v215_v1, 0.0 }
  0xd0   :  { %v179_v42 = vpop.f32.mrf.mxu0  ;;  %v865_v43 = vpop.f32.mrf.mxu1 }
  0xd1   :  { %v180_v44 = vadd.f32 %v725_v31, %v179_v42  ;;  %888 = vmatprep.mubr.msk.f32.mxu1 %vm279_vm1, %v248_v39  ;;  %v251_v48 = vmax.f32 %v185_v41, 0.0  ;;  %v256_v62 = vmax.f32 %v210_v55, 0.0  ;;  %v225_v6 = vadd.f32 %v865_v43, %v725_v31 }
  0xd2   :  { %v856_v45 = vpop.f32.mrf.mxu0  ;;  %889 = vmatmul.mubr.msk.f32.vlgmr.msra.gmra.mxu1 %vm279_vm1, %v249_v40  ;;  %v219_v46 = vpop.f32.mrf.mxu1 }
  0xd3   :  { %v250_v47 = vmax.f32 %v180_v44, 0.0  ;;  %v195_v49 = vadd.f32 %v856_v45, %v725_v31  ;;  %v220_v63 = vadd.f32 %v725_v31, %v219_v46  ;;  %v259_v10 = vmax.f32 %v225_v6, 0.0 }
  0xd4   :  { %v189_v50 = vpop.f32.mrf.mxu0  ;;  %v868_v51 = vpop.f32.mrf.mxu1 }
  0xd5   :  { %v190_v52 = vadd.f32 %v725_v31, %v189_v50  ;;  %891 = vmatprep.mubr.msk.f32.mxu1 %vm279_vm1, %v250_v47  ;;  %v253_v56 = vmax.f32 %v195_v49, 0.0  ;;  %v258_v3 = vmax.f32 %v220_v63, 0.0  ;;  %v235_v11 = vadd.f32 %v868_v51, %v725_v31 }
  0xd6   :  { %v859_v53 = vpop.f32.mrf.mxu0  ;;  %892 = vmatmul.mubr.msk.f32.gmra.mxu1 %vm279_vm1, %v251_v48  ;;  %v229_v59 = vpop.f32.mrf.mxu1 }
  0xd7   :  { %v252_v54 = vmax.f32 %v190_v52, 0.0  ;;  %v205_v57 = vadd.f32 %v859_v53, %v725_v31  ;;  %v230_v4 = vadd.f32 %v725_v31, %v229_v59  ;;  %v261_v13 = vmax.f32 %v235_v11, 0.0 }
  0xd8   :  { %v199_v58 = vpop.f32.mrf.mxu0  ;;  %v871_v2 = vpop.f32.mrf.mxu1 }
  0xd9   :  { %v200_v60 = vadd.f32 %v725_v31, %v199_v58  ;;  %894 = vmatprep.mubr.msk.f32.mxu1 %vm279_vm1, %v252_v54  ;;  %v255_v0 = vmax.f32 %v205_v57, 0.0  ;;  %v260_v8 = vmax.f32 %v230_v4, 0.0  ;;  %v245_v14 = vadd.f32 %v871_v2, %v725_v31  ;;  %v759_v2 = vld [vmem:[%s1182_s6] ss:$0 sm:$0xff]  ;;  %s977_s6 = smov [#allocation2]  }
  0xda   :  { %895 = vmatmul.mubr.msk.f32.gmra.mxu1 %vm279_vm1, %v253_v56  ;;  %v239_v7 = vpop.f32.mrf.mxu1  ;;  %s714_s17 = sshll.u32 %s977_s6, 4  ;;  %s715_s17 = int_to_ptr.vmem [resolvable:$true] %s714_s17 }
  0xdb   :  { %v254_v61 = vmax.f32 %v200_v60, 0.0  ;;  %v240_v9 = vadd.f32 %v725_v31, %v239_v7  ;;  %v263_v15 = vmax.f32 %v245_v14, 0.0  ;;  %s955_s18 = scalar_lea.vmem %s715_s17, 2048  ;;  %p960_p1 = scmp.lt.s32.totalorder %s715_s17, %s715_s17 }
  0xdc   :  { %p956_p0 = scmp.ne.s32.totalorder %s715_s17, %s955_s18  ;;  %p961_p2 = scmp.lt.s32.totalorder %s955_s18, %s955_s18 }
  0xdd   :  { %897 = vmatprep.mubr.msk.f32.mxu1 %vm279_vm1, %v254_v61  ;;  %v262_v12 = vmax.f32 %v240_v9, 0.0 }
  0xde   :  { %898 = vmatmul.mubr.msk.f32.gmra.mxu1 %vm279_vm1, %v255_v0  ;;  %p962_p3 = por %p961_p2, %p960_p1 }
  0xdf   :  { %900 = vmatprep.mubr.msk.f32.mxu1 %vm279_vm1, %v256_v62 }
  0xe0   :  { %p963_p4 = pnand %p962_p3, %p956_p0 }
  0xe2   :  { %901 = vmatmul.mubr.msk.f32.gmra.mxu1 %vm279_vm1, %v257_v5 }
  0xe3   :  { %903 = vmatprep.mubr.msk.f32.mxu1 %vm279_vm1, %v258_v3 }
  0xe6   :  { %904 = vmatmul.mubr.msk.f32.gmra.mxu1 %vm279_vm1, %v259_v10 }
  0xe7   :  { %906 = vmatprep.mubr.msk.f32.mxu1 %vm279_vm1, %v260_v8 }
  0xea   :  { %907 = vmatmul.mubr.msk.f32.gmra.mxu1 %vm279_vm1, %v261_v13 }
  0xeb   :  { %909 = vmatprep.mubr.msk.f32.mxu1 %vm279_vm1, %v262_v12 }
  0xee   :  { %910 = vmatmul.mubr.msk.f32.gmra.mxu1 %vm279_vm1, %v263_v15 }
 0x192   :  { %v890_v18 = vpop.f32.mrf.mxu1 }
 0x193   :  { %v400_v19 = vadd.f32 %v890_v18, %v742_v17 }
 0x194   :  { %v394_v20 = vpop.f32.mrf.mxu1 }
 0x195   :  { %v395_v21 = vadd.f32 %v742_v17, %v394_v20  ;;  %v474_v24 = vmax.f32 %v400_v19, 0.0 }
 0x196   :  { %v893_v22 = vpop.f32.mrf.mxu1 }
 0x197   :  { %v473_v23 = vmax.f32 %v395_v21, 0.0  ;;  %v410_v25 = vadd.f32 %v893_v22, %v742_v17 }
 0x198   :  { %v404_v26 = vpop.f32.mrf.mxu1 }
 0x199   :  { %v405_v27 = vadd.f32 %v742_v17, %v404_v26  ;;  %920 = vmatprep.mubr.msk.f32.mxu0 %vm54_vm0, %v473_v23  ;;  %v476_v30 = vmax.f32 %v410_v25, 0.0 }
 0x19a   :  { %v896_v28 = vpop.f32.mrf.mxu1  ;;  %921 = vmatmul.mubr.msk.f32.vlgmr.msra.gmra.mxu0 %vm54_vm0, %v474_v24 }
 0x19b   :  { %v475_v29 = vmax.f32 %v405_v27, 0.0  ;;  %v420_v31 = vadd.f32 %v896_v28, %v742_v17 }
 0x19c   :  { %v414_v32 = vpop.f32.mrf.mxu1 }
 0x19d   :  { %v415_v33 = vadd.f32 %v742_v17, %v414_v32  ;;  %923 = vmatprep.mubr.msk.f32.mxu0 %vm54_vm0, %v475_v29  ;;  %v478_v36 = vmax.f32 %v420_v31, 0.0 }
 0x19e   :  { %v899_v34 = vpop.f32.mrf.mxu1  ;;  %924 = vmatmul.mubr.msk.f32.gmra.mxu0 %vm54_vm0, %v476_v30 }
 0x19f   :  { %v477_v35 = vmax.f32 %v415_v33, 0.0  ;;  %v430_v37 = vadd.f32 %v899_v34, %v742_v17 }
 0x1a0   :  { %v424_v38 = vpop.f32.mrf.mxu1 }
 0x1a1   :  { %v425_v39 = vadd.f32 %v742_v17, %v424_v38  ;;  %926 = vmatprep.mubr.msk.f32.mxu0 %vm54_vm0, %v477_v35  ;;  %v480_v42 = vmax.f32 %v430_v37, 0.0 }
 0x1a2   :  { %v902_v40 = vpop.f32.mrf.mxu1  ;;  %927 = vmatmul.mubr.msk.f32.gmra.mxu0 %vm54_vm0, %v478_v36 }
 0x1a3   :  { %v479_v41 = vmax.f32 %v425_v39, 0.0  ;;  %v440_v43 = vadd.f32 %v902_v40, %v742_v17 }
 0x1a4   :  { %v434_v44 = vpop.f32.mrf.mxu1 }
 0x1a5   :  { %v435_v45 = vadd.f32 %v742_v17, %v434_v44  ;;  %929 = vmatprep.mubr.msk.f32.mxu0 %vm54_vm0, %v479_v41  ;;  %v482_v48 = vmax.f32 %v440_v43, 0.0 }
 0x1a6   :  { %v905_v46 = vpop.f32.mrf.mxu1  ;;  %930 = vmatmul.mubr.msk.f32.gmra.mxu0 %vm54_vm0, %v480_v42 }
 0x1a7   :  { %v481_v47 = vmax.f32 %v435_v45, 0.0  ;;  %v450_v49 = vadd.f32 %v905_v46, %v742_v17 }
 0x1a8   :  { %v444_v50 = vpop.f32.mrf.mxu1 }
 0x1a9   :  { %v445_v51 = vadd.f32 %v742_v17, %v444_v50  ;;  %932 = vmatprep.mubr.msk.f32.mxu0 %vm54_vm0, %v481_v47  ;;  %v484_v54 = vmax.f32 %v450_v49, 0.0 }
 0x1aa   :  { %v908_v52 = vpop.f32.mrf.mxu1  ;;  %933 = vmatmul.mubr.msk.f32.gmra.mxu0 %vm54_vm0, %v482_v48 }
 0x1ab   :  { %v483_v53 = vmax.f32 %v445_v51, 0.0  ;;  %v460_v55 = vadd.f32 %v908_v52, %v742_v17 }
 0x1ac   :  { %v454_v56 = vpop.f32.mrf.mxu1 }
 0x1ad   :  { %v455_v57 = vadd.f32 %v742_v17, %v454_v56  ;;  %935 = vmatprep.mubr.msk.f32.mxu0 %vm54_vm0, %v483_v53  ;;  %v486_v60 = vmax.f32 %v460_v55, 0.0 }
 0x1ae   :  { %v911_v58 = vpop.f32.mrf.mxu1  ;;  %936 = vmatmul.mubr.msk.f32.gmra.mxu0 %vm54_vm0, %v484_v54 }
 0x1af   :  { %v485_v59 = vmax.f32 %v455_v57, 0.0  ;;  %v470_v61 = vadd.f32 %v911_v58, %v742_v17 }
 0x1b0   :  { %v464_v62 = vpop.f32.mrf.mxu1 }
 0x1b1   :  { %v465_v63 = vadd.f32 %v742_v17, %v464_v62  ;;  %938 = vmatprep.mubr.msk.f32.mxu0 %vm54_vm0, %v485_v59  ;;  %v488_v1 = vmax.f32 %v470_v61, 0.0 }
 0x1b2   :  { %939 = vmatmul.mubr.msk.f32.gmra.mxu0 %vm54_vm0, %v486_v60 }
 0x1b3   :  { %v487_v0 = vmax.f32 %v465_v63, 0.0 }
 0x1b5   :  { %941 = vmatprep.mubr.msk.f32.mxu0 %vm54_vm0, %v487_v0 }
 0x1b6   :  { %942 = vmatmul.mubr.msk.f32.gmra.mxu0 %vm54_vm0, %v488_v1 }
 0x25a   :  { %v922_v3 = vpop.f32.mrf.mxu0 }
 0x25b   :  { %v620_v4 = vadd.f32 %v922_v3, %v759_v2 }
 0x25c   :  { %v614_v5 = vpop.f32.mrf.mxu0 }
 0x25d   :  { %694 = vst [vmem:[#allocation2 + $0x8] sm:$0xff] %v620_v4  ;;  %v615_v6 = vadd.f32 %v759_v2, %v614_v5 }
 0x25e   :  { %v925_v7 = vpop.f32.mrf.mxu0 }
 0x25f   :  { %693 = vst [vmem:[#allocation2] sm:$0xff] %v615_v6  ;;  %v630_v8 = vadd.f32 %v925_v7, %v759_v2 }
 0x260   :  { %v624_v9 = vpop.f32.mrf.mxu0 }
 0x261   :  { %696 = vst [vmem:[#allocation2 + $0x18] sm:$0xff] %v630_v8  ;;  %v625_v10 = vadd.f32 %v759_v2, %v624_v9 }
 0x262   :  { %v928_v11 = vpop.f32.mrf.mxu0 }
 0x263   :  { %695 = vst [vmem:[#allocation2 + $0x10] sm:$0xff] %v625_v10  ;;  %v640_v12 = vadd.f32 %v928_v11, %v759_v2 }
 0x264   :  { %v634_v13 = vpop.f32.mrf.mxu0 }
 0x265   :  { %698 = vst [vmem:[#allocation2 + $0x28] sm:$0xff] %v640_v12  ;;  %v635_v14 = vadd.f32 %v759_v2, %v634_v13 }
 0x266   :  { %v931_v15 = vpop.f32.mrf.mxu0 }
 0x267   :  { %697 = vst [vmem:[#allocation2 + $0x20] sm:$0xff] %v635_v14  ;;  %v650_v16 = vadd.f32 %v931_v15, %v759_v2 }
 0x268   :  { %v644_v17 = vpop.f32.mrf.mxu0 }
 0x269   :  { %700 = vst [vmem:[#allocation2 + $0x38] sm:$0xff] %v650_v16  ;;  %v645_v18 = vadd.f32 %v759_v2, %v644_v17 }
 0x26a   :  { %v934_v19 = vpop.f32.mrf.mxu0 }
 0x26b   :  { %699 = vst [vmem:[#allocation2 + $0x30] sm:$0xff] %v645_v18  ;;  %v660_v20 = vadd.f32 %v934_v19, %v759_v2 }
 0x26c   :  { %v654_v21 = vpop.f32.mrf.mxu0 }
 0x26d   :  { %702 = vst [vmem:[#allocation2 + $0x48] sm:$0xff] %v660_v20  ;;  %v655_v22 = vadd.f32 %v759_v2, %v654_v21 }
 0x26e   :  { %v937_v23 = vpop.f32.mrf.mxu0 }
 0x26f   :  { %701 = vst [vmem:[#allocation2 + $0x40] sm:$0xff] %v655_v22  ;;  %v670_v24 = vadd.f32 %v937_v23, %v759_v2 }
 0x270   :  { %v664_v25 = vpop.f32.mrf.mxu0 }
 0x271   :  { %704 = vst [vmem:[#allocation2 + $0x58] sm:$0xff] %v670_v24  ;;  %v665_v26 = vadd.f32 %v759_v2, %v664_v25 }
 0x272   :  { %v940_v27 = vpop.f32.mrf.mxu0 }
 0x273   :  { %703 = vst [vmem:[#allocation2 + $0x50] sm:$0xff] %v665_v26  ;;  %v680_v28 = vadd.f32 %v940_v27, %v759_v2 }
 0x274   :  { %v674_v29 = vpop.f32.mrf.mxu0 }
 0x275   :  { %706 = vst [vmem:[#allocation2 + $0x68] sm:$0xff] %v680_v28  ;;  %v675_v30 = vadd.f32 %v759_v2, %v674_v29 }
 0x276   :  { %v943_v31 = vpop.f32.mrf.mxu0 }
 0x277   :  { %705 = vst [vmem:[#allocation2 + $0x60] sm:$0xff] %v675_v30  ;;  %v690_v32 = vadd.f32 %v943_v31, %v759_v2 }
 0x278   :  { %v684_v33 = vpop.f32.mrf.mxu0 }
 0x279   :  { %708 = vst [vmem:[#allocation2 + $0x78] sm:$0xff] %v690_v32  ;;  %v685_v34 = vadd.f32 %v759_v2, %v684_v33 }
 0x27b   :  { %707 = vst [vmem:[#allocation2 + $0x70] sm:$0xff] %v685_v34 }
 0x27c   :  { %966 = shalt.err (!%p963_p4)
}
 0x27d   :  { %s978_s19 = smov 128   ;;  %s979_s20 = smov 8  }
 0x27e   :  { %720 = dma.vmem_to_hbm [thread:$0]  %s715_s17, 2048, %s1183_s7, [#allocation3], %s978_s19, %s978_s19, %s979_s20  }
 0x27f   :  { %975 = dma.done.wait [#allocation3], 2048  }
 0x280   :  { %976 = vsyncadd [#allocation3], 4294965248 }
 0x281   :  { %724 = vsyncpa [#allocation3], 1 }

</bundles_post_ra>
